<compile_context>
chip_gen: v6e
topology: v6e:2x2x1
jax: 0.10.0
libtpu: 0.0.40
codegen_flags: <defaults>
</compile_context>

<pallas_src>
import jax
import jax.numpy as jnp
from jax.experimental import pallas as pl
from jax.experimental.pallas import tpu as pltpu

_LANE = 128


def _hard_sigmoid_kernel(x_ref, o_ref):
    x = x_ref[...]
    # relu6(x + 3) / 6  ==  clamp(x + 3, 0, 6) / 6  (division to match torch exactly)
    o_ref[...] = (jnp.clip(x + 3.0, 0.0, 6.0) / 6.0).astype(o_ref.dtype)


def _sublane(dtype) -> int:
    # Minimum sublane multiple for a packed vreg tile: f32 -> 8, bf16 -> 16, int8/fp8 -> 32.
    itemsize = jnp.dtype(dtype).itemsize
    return max(8, 32 // itemsize)


def hard_sigmoid(x: jax.Array, *, target_block_bytes: int = 2 * 1024 * 1024) -> jax.Array:
    """Pallas TPU hard-sigmoid, matching HardSigmoid.forward (relu6(x+3)/6)."""
    orig_shape = x.shape
    dtype = x.dtype
    n = x.size
    if n == 0:
        return x

    itemsize = jnp.dtype(dtype).itemsize
    sub = _sublane(dtype)
    chunk = sub * _LANE

    # Pad only to a multiple of (sublane * 128): at most chunk-1 extra elements.
    n_pad = pl.cdiv(n, chunk) * chunk
    x_flat = jnp.ravel(x)
    if n_pad != n:
        x_flat = jnp.pad(x_flat, (0, n_pad - n))
    rows = n_pad // _LANE  # multiple of `sub`
    x2d = x_flat.reshape(rows, _LANE)

    # Block size: ~target_block_bytes per block, sublane-aligned for the dtype.
    tile_rows = max(sub, (target_block_bytes // (_LANE * itemsize)) // sub * sub)
    if rows > 2 * sub:
        # Keep >= 2 grid steps so v7x's two TensorCores both get work.
        half = pl.cdiv(pl.cdiv(rows, 2), sub) * sub
        tile_rows = min(tile_rows, half)
    tile_rows = min(tile_rows, rows)

    grid = (pl.cdiv(rows, tile_rows),)  # partial last block is masked by Pallas

    out2d = pl.pallas_call(
        _hard_sigmoid_kernel,
        out_shape=jax.ShapeDtypeStruct((rows, _LANE), dtype),
        grid_spec=pltpu.PrefetchScalarGridSpec(
            num_scalar_prefetch=0,
            grid=grid,
            in_specs=[pl.BlockSpec((tile_rows, _LANE), lambda i: (i, 0))],
            out_specs=pl.BlockSpec((tile_rows, _LANE), lambda i: (i, 0)),
        ),
        compiler_params=pltpu.CompilerParams(
            dimension_semantics=("parallel",),
            vmem_limit_bytes=32 * 1024 * 1024,
        ),
        cost_estimate=pl.CostEstimate(
            flops=3 * n_pad,
            transcendentals=0,
            bytes_accessed=2 * n_pad * itemsize,
        ),
    )(x2d)

    out_flat = out2d.reshape(-1)
    if n_pad != n:
        out_flat = out_flat[:n]
    return out_flat.reshape(orig_shape)


def hard_sigmoid_ref(x):
    return jnp.clip(x + 3.0, 0.0, 6.0) / 6.0


if __name__ == "__main__":
    key = jax.random.PRNGKey(0)

    # NCHW activation, small shape consistent with a MobileViT conv block.
    x = jax.random.normal(key, (2, 4, 16, 16), dtype=jnp.float32) * 4.0
    y = hard_sigmoid(x)
    jax.block_until_ready(y)
    assert y.shape == x.shape and y.dtype == x.dtype
    assert jnp.allclose(y, hard_sigmoid_ref(x), atol=1e-6, rtol=1e-6)

    # Second case exercising the cdiv grid with a masked partial last block.
    x2 = jax.random.normal(jax.random.PRNGKey(1), (5, 8, 8, 16), dtype=jnp.float32) * 4.0
    y2 = hard_sigmoid(x2)
    jax.block_until_ready(y2)
    assert y2.shape == x2.shape and y2.dtype == x2.dtype
    assert jnp.allclose(y2, hard_sigmoid_ref(x2), atol=1e-6, rtol=1e-6)

    print("KERNEL_OK")
</pallas_src>

<mosaic_0001>
module attributes {stable_mosaic.version = 11 : i64} {
  func.func @_hard_sigmoid_kernel(%arg0: i32, %arg1: memref<16x128xf32, #tpu.memory_space<vmem>>, %arg2: memref<16x128xf32, #tpu.memory_space<vmem>>) attributes {dimension_semantics = [#tpu.dimension_semantics<parallel>], iteration_bounds = array<i64: 1>, scalar_prefetch = 0 : i64, scratch_operands = 0 : i64, tpu.core_type = #tpu.core_type<tc>, window_params = [{transform_indices = @transform_0, window_bounds = array<i64: 16, 128>}, {transform_indices = @transform_1, window_bounds = array<i64: 16, 128>}]} {
    %c0 = arith.constant 0 : index
    %c0_0 = arith.constant 0 : index
    %0 = vector.load %arg1[%c0, %c0_0] : memref<16x128xf32, #tpu.memory_space<vmem>>, vector<16x128xf32>
    %cst = arith.constant 3.000000e+00 : f32
    %1 = vector.broadcast %cst : f32 to vector<16x128xf32>
    %2 = arith.addf %0, %1 : vector<16x128xf32>
    %cst_1 = arith.constant 0.000000e+00 : f32
    %cst_2 = arith.constant 6.000000e+00 : f32
    %3 = vector.broadcast %cst_1 : f32 to vector<16x128xf32>
    %4 = arith.maximumf %3, %2 : vector<16x128xf32>
    %5 = vector.broadcast %cst_2 : f32 to vector<16x128xf32>
    %6 = arith.minimumf %5, %4 : vector<16x128xf32>
    %cst_3 = arith.constant 6.000000e+00 : f32
    %7 = vector.broadcast %cst_3 : f32 to vector<16x128xf32>
    %8 = arith.divf %6, %7 : vector<16x128xf32>
    %c0_4 = arith.constant 0 : index
    %c0_5 = arith.constant 0 : index
    %9 = vector.load %arg2[%c0_4, %c0_5] : memref<16x128xf32, #tpu.memory_space<vmem>>, vector<16x128xf32>
    tpu.vector_store %arg2[%c0_4, %c0_5], %8 {strides = array<i32>} : memref<16x128xf32, #tpu.memory_space<vmem>>, vector<16x128xf32>,
    return
  }
  func.func @transform_0(%arg0: i32) -> (i32, i32) {
    %c0_i32 = arith.constant 0 : i32
    %c0_i32_0 = arith.constant 0 : i32
    return %arg0, %c0_i32 : i32, i32
  }
  func.func @transform_1(%arg0: i32) -> (i32, i32) {
    %c0_i32 = arith.constant 0 : i32
    %c0_i32_0 = arith.constant 0 : i32
    return %arg0, %c0_i32 : i32, i32
  }
}

</mosaic_0001>

<bundles_post_ra>
// kernel: tpu_custom_call.1
= control target key start
LH: loop header
LB: loop body
LE: loop exit
PB: predicated region body
PF: predicated region fallthrough
CT: control target
= control target key end

     0   :  { %6 = vsyncpa [#allocation3], 0  ;;  %s127_s0 = inlined_call_operand.hbm [shape: f32[16,128], index: 0, kind: input, shape index: {}]   ;;  %s128_s1 = inlined_call_operand.hbm [shape: f32[16,128], index: 1, kind: output, shape index: {}]  }
   0x1   :  { %7 = vsyncpa [#allocation4], 0  ;;  %s101_s6 = smov [#allocation2]  }
   0x2   :  { %s13_s7 = sshll.u32 %s101_s6, 4  ;;  %s14_s7 = int_to_ptr.vmem [resolvable:$true] %s13_s7 }
   0x3   :  { %s65_s8 = scalar_lea.vmem %s14_s7, 256  ;;  %p70_p1 = scmp.lt.s32.totalorder %s14_s7, %s14_s7 }
   0x4   :  { %p66_p0 = scmp.ne.s32.totalorder %s14_s7, %s65_s8  ;;  %p71_p2 = scmp.lt.s32.totalorder %s65_s8, %s65_s8 }
   0x6   :  { %p72_p3 = por %p71_p2, %p70_p1 }
   0x8   :  { %p73_p4 = pnand %p72_p3, %p66_p0 }
   0xa   :  { %76 = shalt.err (!%p73_p4)
}
   0xb   :  { %s102_s9 = smov 128   ;;  %s103_s10 = smov 8  }
   0xc   :  { %19 = dma.hbm_to_vmem [thread:$0]  %s127_s0, 256, %s14_s7, [#allocation3], %s102_s9, %s102_s9, %s103_s10  }
   0xd   :  { %97 = dma.done.wait [#allocation3], 256  }
   0xe   :  { %98 = vsyncadd [#allocation3], 4294967040  ;;  %v23_v0 = vld [vmem:[#allocation2] sm:$0xff]  ;;  %v24_v1 = vld [vmem:[#allocation2 + $0x8] sm:$0xff]  ;;  %s104_s13 = smov [#allocation5]  }
   0xf   :  { %v25_v2 = vadd.f32 3.0, %v23_v0  ;;  %v26_v3 = vadd.f32 3.0, %v24_v1  ;;  %s41_s14 = sshll.u32 %s104_s13, 4  ;;  %s42_s14 = int_to_ptr.vmem [resolvable:$true] %s41_s14 }
  0x10   :  { %s77_s15 = scalar_lea.vmem %s42_s14, 256  ;;  %p82_p6 = scmp.lt.s32.totalorder %s42_s14, %s42_s14 }
  0x11   :  { %v27_v4 = vmax.f32 %v25_v2, 0.0  ;;  %v28_v5 = vmax.f32 %v26_v3, 0.0  ;;  %p78_p5 = scmp.ne.s32.totalorder %s42_s14, %s77_s15  ;;  %p83_p7 = scmp.lt.s32.totalorder %s77_s15, %s77_s15 }
  0x13   :  { %v29_v6 = vmin.f32 %v27_v4, 6.0  ;;  %v30_v7 = vmin.f32 %v28_v5, 6.0  ;;  %p84_p8 = por %p83_p7, %p82_p6 }
  0x15   :  { %v32_v8 = vmul.f32 0.16666667, %v29_v6  ;;  %v33_v9 = vmul.f32 0.16666667, %v30_v7  ;;  %p85_p9 = pnand %p84_p8, %p78_p5 }
  0x17   :  { %34 = vst [vmem:[#allocation5] sm:$0xff] %v32_v8  ;;  %35 = vst [vmem:[#allocation5 + $0x8] sm:$0xff] %v33_v9 }
  0x18   :  { %88 = shalt.err (!%p85_p9)
}
  0x19   :  { %47 = dma.vmem_to_hbm [thread:$0]  %s42_s14, 256, %s128_s1, [#allocation4], %s102_s9, %s102_s9, %s103_s10  }
  0x1a   :  { %99 = dma.done.wait [#allocation4], 256  }
  0x1b   :  { %100 = vsyncadd [#allocation4], 4294967040 }
  0x1c   :  { %51 = vsyncpa [#allocation3], 1 }
  0x1d   :  { %52 = vsyncpa [#allocation4], 1 }

</bundles_post_ra>
